<compile_context>
chip_gen: v5e
topology: v5e:2x2
jax: 0.10.0
libtpu: 0.0.40
codegen_flags: <defaults>
</compile_context>

<pallas_src>
import jax
import jax.numpy as jnp
from jax.experimental import pallas as pl
from jax.experimental.pallas import tpu as pltpu


OUT_F = 4        # real number of classes
OUT_PAD = 8      # padded to a full sublane group inside pass 1


# --------------------- Pass 1: batch-tiled MLP -> logits --------------------

def mlp_logits_kernel(xt_ref, w1t_ref, b1t_ref, w2t_ref, b2t_ref,
                      w3t_ref, b3t_ref, lt_ref):
    # xt_ref : (16, TB)  bf16   -- batch on lanes
    # w*t    : (out, in) bf16   -- transposed weights (VMEM-resident)
    # b*t    : (out, 1)  f32
    # lt_ref : (OUT_PAD, TB) f32 -- transposed logits (lane-dense store)
    h1 = jnp.dot(w1t_ref[...], xt_ref[...],
                 preferred_element_type=jnp.float32)            # (128, TB) f32
    h1 = jnp.maximum(h1 + b1t_ref[...], 0.0)

    h2 = jnp.dot(w2t_ref[...], h1.astype(jnp.bfloat16),
                 preferred_element_type=jnp.float32)            # (128, TB) f32
    h2 = jnp.maximum(h2 + b2t_ref[...], 0.0)

    logits = jnp.dot(w3t_ref[...], h2.astype(jnp.bfloat16),
                     preferred_element_type=jnp.float32)        # (OUT_PAD, TB)
    lt_ref[...] = logits + b3t_ref[...]


# ----------------- Pass 2: softmax over the original dim 0 ------------------

def softmax_dim0_kernel(lt_ref, o_ref):
    # lt_ref/o_ref: (OUT_F, B) f32 -- original batch axis is the lane axis.
    lt = lt_ref[...]
    m = jnp.max(lt, axis=1, keepdims=True)
    e = jnp.exp(lt - m)
    s = jnp.sum(e, axis=1, keepdims=True)
    o_ref[...] = e * pl.reciprocal(s, approx=True)


def _round_up(n, m):
    return ((n + m - 1) // m) * m


def net_forward(x, w1, b1, w2, b2, w3, b3, *, tb=1024):
    """x: (B, 16) f32; weights stored (in, out) f32, biases (out,) f32."""
    B = x.shape[0]
    TB = min(tb, _round_up(B, 128))         # lane-aligned batch tile
    Bp = _round_up(B, TB)

    # ---- wrapper-side layout plumbing (batch -> lanes, bf16 MXU feeds) ----
    xt = jnp.pad(x, ((0, Bp - B), (0, 0))).T.astype(jnp.bfloat16)   # (16, Bp)
    w1t = w1.T.astype(jnp.bfloat16)                                 # (128, 16)
    w2t = w2.T.astype(jnp.bfloat16)                                 # (128, 128)
    w3t = jnp.pad(w3, ((0, 0), (0, OUT_PAD - OUT_F))).T.astype(jnp.bfloat16)
    b1t = b1.reshape(-1, 1).astype(jnp.float32)                     # (128, 1)
    b2t = b2.reshape(-1, 1).astype(jnp.float32)                     # (128, 1)
    b3t = jnp.pad(b3, ((0, OUT_PAD - OUT_F),)).reshape(-1, 1).astype(jnp.float32)

    full = lambda a: pl.BlockSpec(a.shape, lambda i: (0,) * a.ndim)

    logits_t = pl.pallas_call(
        mlp_logits_kernel,
        out_shape=jax.ShapeDtypeStruct((OUT_PAD, Bp), jnp.float32),
        grid=(Bp // TB,),
        in_specs=[
            pl.BlockSpec((16, TB), lambda i: (0, i)),   # x tiles (pipelined)
            full(w1t), full(b1t),                       # weights stay resident
            full(w2t), full(b2t),
            full(w3t), full(b3t),
        ],
        out_specs=pl.BlockSpec((OUT_PAD, TB), lambda i: (0, i)),
        compiler_params=pltpu.CompilerParams(
            dimension_semantics=("parallel",)),
    )(xt, w1t, b1t, w2t, b2t, w3t, b3t)

    # Global softmax over dim 0: use only the real B rows (drop batch padding
    # and the padded class rows). (4, B) logits are tiny; single-block kernel.
    # TODO(synk): for B beyond ~1M rows this block would need its own grid +
    # two-pass reduction to respect VMEM limits.
    logits_t = logits_t[:OUT_F, :B]
    out_t = pl.pallas_call(
        softmax_dim0_kernel,
        out_shape=jax.ShapeDtypeStruct((OUT_F, B), jnp.float32),
        in_specs=[pl.BlockSpec((OUT_F, B), lambda: (0, 0))],
        out_specs=pl.BlockSpec((OUT_F, B), lambda: (0, 0)),
    )(logits_t)

    return out_t.T                                                   # (B, 4)


def init_params(key):
    """Deterministic init mirroring nn.Linear default (uniform +- 1/sqrt(fan_in))."""
    def linear(key, fan_in, fan_out):
        kw, kb = jax.random.split(key)
        bound = 1.0 / jnp.sqrt(float(fan_in))
        w = jax.random.uniform(kw, (fan_in, fan_out), jnp.float32, -bound, bound)
        b = jax.random.uniform(kb, (fan_out,), jnp.float32, -bound, bound)
        return w, b

    k1, k2, k3 = jax.random.split(key, 3)
    w1, b1 = linear(k1, 16, 128)
    w2, b2 = linear(k2, 128, 128)
    w3, b3 = linear(k3, 128, 4)
    return w1, b1, w2, b2, w3, b3


if __name__ == "__main__":
    key = jax.random.PRNGKey(0)
    k_params, k_x = jax.random.split(key)

    w1, b1, w2, b2, w3, b3 = init_params(k_params)

    B = 8
    x = jax.random.normal(k_x, (B, 16), jnp.float32)

    out = net_forward(x, w1, b1, w2, b2, w3, b3)
    out = jax.block_until_ready(out)

    # pure-JAX f32 reference (module semantics; f64 not available on TPU)
    h1 = jnp.maximum(x @ w1 + b1, 0.0)
    h2 = jnp.maximum(h1 @ w2 + b2, 0.0)
    ref = jax.nn.softmax(h2 @ w3 + b3, axis=0)

    assert out.shape == (B, 4)
    # bf16-fed MXU + approx reciprocal => loosened tolerance vs f32 reference
    assert jnp.allclose(out, ref, atol=2e-2, rtol=2e-2), "mismatch vs reference"

    print("KERNEL_OK")
</pallas_src>

<mosaic_0001>
module attributes {stable_mosaic.version = 11 : i64} {
  func.func @mlp_logits_kernel(%arg0: i32, %arg1: memref<16x128xbf16, #tpu.memory_space<vmem>>, %arg2: memref<128x16xbf16, #tpu.memory_space<vmem>>, %arg3: memref<128x1xf32, #tpu.memory_space<vmem>>, %arg4: memref<128x128xbf16, #tpu.memory_space<vmem>>, %arg5: memref<128x1xf32, #tpu.memory_space<vmem>>, %arg6: memref<8x128xbf16, #tpu.memory_space<vmem>>, %arg7: memref<8x1xf32, #tpu.memory_space<vmem>>, %arg8: memref<8x128xf32, #tpu.memory_space<vmem>>) attributes {dimension_semantics = [#tpu.dimension_semantics<parallel>], iteration_bounds = array<i64: 1>, scalar_prefetch = 0 : i64, scratch_operands = 0 : i64, tpu.core_type = #tpu.core_type<tc>, window_params = [{transform_indices = @transform_0, window_bounds = array<i64: 16, 128>}, {pipeline_mode = #tpu.pipeline_mode<synchronous>, transform_indices = @transform_1, window_bounds = array<i64: 128, 16>}, {pipeline_mode = #tpu.pipeline_mode<synchronous>, transform_indices = @transform_2, window_bounds = array<i64: 128, 1>}, {pipeline_mode = #tpu.pipeline_mode<synchronous>, transform_indices = @transform_3, window_bounds = array<i64: 128, 128>}, {pipeline_mode = #tpu.pipeline_mode<synchronous>, transform_indices = @transform_4, window_bounds = array<i64: 128, 1>}, {pipeline_mode = #tpu.pipeline_mode<synchronous>, transform_indices = @transform_5, window_bounds = array<i64: 8, 128>}, {pipeline_mode = #tpu.pipeline_mode<synchronous>, transform_indices = @transform_6, window_bounds = array<i64: 8, 1>}, {transform_indices = @transform_7, window_bounds = array<i64: 8, 128>}]} {
    %c0 = arith.constant 0 : index
    %c0_0 = arith.constant 0 : index
    %0 = vector.load %arg2[%c0, %c0_0] : memref<128x16xbf16, #tpu.memory_space<vmem>>, vector<128x16xbf16>
    %c0_1 = arith.constant 0 : index
    %c0_2 = arith.constant 0 : index
    %1 = vector.load %arg1[%c0_1, %c0_2] : memref<16x128xbf16, #tpu.memory_space<vmem>>, vector<16x128xbf16>
    %cst = arith.constant dense<0.000000e+00> : vector<128x128xf32>
    %2 = tpu.matmul %0, %1, %cst {dimension_numbers = #tpu.dot_dimension_numbers<[1], [0], [0], [1], [0, 0, 1, 1], [], []>} : vector<128x16xbf16>, vector<16x128xbf16>, vector<128x128xf32> -> vector<128x128xf32>
    %c0_3 = arith.constant 0 : index
    %c0_4 = arith.constant 0 : index
    %3 = vector.load %arg3[%c0_3, %c0_4] : memref<128x1xf32, #tpu.memory_space<vmem>>, vector<128x1xf32>
    %4 = vector.broadcast %3 : vector<128x1xf32> to vector<128x128xf32>
    %5 = arith.addf %2, %4 : vector<128x128xf32>
    %cst_5 = arith.constant 0.000000e+00 : f32
    %6 = vector.broadcast %cst_5 : f32 to vector<128x128xf32>
    %7 = arith.maximumf %5, %6 : vector<128x128xf32>
    %c0_6 = arith.constant 0 : index
    %c0_7 = arith.constant 0 : index
    %8 = vector.load %arg4[%c0_6, %c0_7] : memref<128x128xbf16, #tpu.memory_space<vmem>>, vector<128x128xbf16>
    %9 = arith.truncf %7 : vector<128x128xf32> to vector<128x128xbf16>
    %cst_8 = arith.constant dense<0.000000e+00> : vector<128x128xf32>
    %10 = tpu.matmul %8, %9, %cst_8 {dimension_numbers = #tpu.dot_dimension_numbers<[1], [0], [0], [1], [0, 0, 1, 1], [], []>} : vector<128x128xbf16>, vector<128x128xbf16>, vector<128x128xf32> -> vector<128x128xf32>
    %c0_9 = arith.constant 0 : index
    %c0_10 = arith.constant 0 : index
    %11 = vector.load %arg5[%c0_9, %c0_10] : memref<128x1xf32, #tpu.memory_space<vmem>>, vector<128x1xf32>
    %12 = vector.broadcast %11 : vector<128x1xf32> to vector<128x128xf32>
    %13 = arith.addf %10, %12 : vector<128x128xf32>
    %cst_11 = arith.constant 0.000000e+00 : f32
    %14 = vector.broadcast %cst_11 : f32 to vector<128x128xf32>
    %15 = arith.maximumf %13, %14 : vector<128x128xf32>
    %c0_12 = arith.constant 0 : index
    %c0_13 = arith.constant 0 : index
    %16 = vector.load %arg6[%c0_12, %c0_13] : memref<8x128xbf16, #tpu.memory_space<vmem>>, vector<8x128xbf16>
    %17 = arith.truncf %15 : vector<128x128xf32> to vector<128x128xbf16>
    %cst_14 = arith.constant dense<0.000000e+00> : vector<8x128xf32>
    %18 = tpu.matmul %16, %17, %cst_14 {dimension_numbers = #tpu.dot_dimension_numbers<[1], [0], [0], [1], [0, 0, 1, 1], [], []>} : vector<8x128xbf16>, vector<128x128xbf16>, vector<8x128xf32> -> vector<8x128xf32>
    %c0_15 = arith.constant 0 : index
    %c0_16 = arith.constant 0 : index
    %19 = vector.load %arg7[%c0_15, %c0_16] : memref<8x1xf32, #tpu.memory_space<vmem>>, vector<8x1xf32>
    %20 = vector.broadcast %19 : vector<8x1xf32> to vector<8x128xf32>
    %21 = arith.addf %18, %20 : vector<8x128xf32>
    %c0_17 = arith.constant 0 : index
    %c0_18 = arith.constant 0 : index
    %22 = vector.load %arg8[%c0_17, %c0_18] : memref<8x128xf32, #tpu.memory_space<vmem>>, vector<8x128xf32>
    tpu.vector_store %arg8[%c0_17, %c0_18], %21 {strides = array<i32>} : memref<8x128xf32, #tpu.memory_space<vmem>>, vector<8x128xf32>,
    return
  }
  func.func @transform_0(%arg0: i32) -> (i32, i32) {
    %c0_i32 = arith.constant 0 : i32
    %c0_i32_0 = arith.constant 0 : i32
    return %c0_i32, %arg0 : i32, i32
  }
  func.func @transform_1(%arg0: i32) -> (i32, i32) {
    %c0_i32 = arith.constant 0 : i32
    %c0_i32_0 = arith.constant 0 : i32
    %c0_i32_1 = arith.constant 0 : i32
    return %c0_i32, %c0_i32_0 : i32, i32
  }
  func.func @transform_2(%arg0: i32) -> (i32, i32) {
    %c0_i32 = arith.constant 0 : i32
    %c0_i32_0 = arith.constant 0 : i32
    %c0_i32_1 = arith.constant 0 : i32
    return %c0_i32, %c0_i32_0 : i32, i32
  }
  func.func @transform_3(%arg0: i32) -> (i32, i32) {
    %c0_i32 = arith.constant 0 : i32
    %c0_i32_0 = arith.constant 0 : i32
    %c0_i32_1 = arith.constant 0 : i32
    return %c0_i32, %c0_i32_0 : i32, i32
  }
  func.func @transform_4(%arg0: i32) -> (i32, i32) {
    %c0_i32 = arith.constant 0 : i32
    %c0_i32_0 = arith.constant 0 : i32
    %c0_i32_1 = arith.constant 0 : i32
    return %c0_i32, %c0_i32_0 : i32, i32
  }
  func.func @transform_5(%arg0: i32) -> (i32, i32) {
    %c0_i32 = arith.constant 0 : i32
    %c0_i32_0 = arith.constant 0 : i32
    %c0_i32_1 = arith.constant 0 : i32
    return %c0_i32, %c0_i32_0 : i32, i32
  }
  func.func @transform_6(%arg0: i32) -> (i32, i32) {
    %c0_i32 = arith.constant 0 : i32
    %c0_i32_0 = arith.constant 0 : i32
    %c0_i32_1 = arith.constant 0 : i32
    return %c0_i32, %c0_i32_0 : i32, i32
  }
  func.func @transform_7(%arg0: i32) -> (i32, i32) {
    %c0_i32 = arith.constant 0 : i32
    %c0_i32_0 = arith.constant 0 : i32
    return %c0_i32, %arg0 : i32, i32
  }
}

</mosaic_0001>

<bundles_post_ra>
// kernel: tpu_custom_call.1
= control target key start
LH: loop header
LB: loop body
LE: loop exit
PB: predicated region body
PF: predicated region fallthrough
CT: control target
= control target key end

     0   :  { %v689_v2 = vmov 0   ;;  %vm188_vm0 = vcmask 130048   ;;  %s901_s0 = inlined_call_operand.vmem [shape: bf16[16,128], index: 0, kind: input, shape index: {}]   ;;  %s902_s1 = inlined_call_operand.vmem [shape: bf16[128,16], index: 1, kind: input, shape index: {}]   ;;  %s903_s2 = inlined_call_operand.vmem [shape: f32[128,1], index: 2, kind: input, shape index: {}]   ;;  %s904_s3 = inlined_call_operand.vmem [shape: bf16[128,128], index: 3, kind: input, shape index: {}]   ;;  %s905_s4 = inlined_call_operand.vmem [shape: f32[128,1], index: 4, kind: input, shape index: {}]   ;;  %s906_s5 = inlined_call_operand.vmem [shape: bf16[8,128], index: 5, kind: input, shape index: {}]   ;;  %s907_s6 = inlined_call_operand.vmem [shape: f32[8,1], index: 6, kind: input, shape index: {}]   ;;  %s908_s7 = inlined_call_operand.hbm [shape: f32[8,128], index: 7, kind: output, shape index: {}]  }
   0x1   :  { %v60_v0 = vld [vmem:[%s903_s2 + $0x70] sm:$0xff]  ;;  %v640_v1 = vld [vmem:[%s901_s0] sm:$0xff]  ;;  %660 = vset.pattern.permute.xlu0 %v689_v2  ;;  %662 = vset.pattern.permute.xlu2 %v689_v2  ;;  %v61_v7 = vld [vmem:[%s903_s2 + $0x78] sm:$0xff] }
   0x2   :  { %v632_v3 = vld [vmem:[%s902_s1] sm:$0xff]  ;;  %v56_v5 = vld [vmem:[%s903_s2 + $0x50] sm:$0xff]  ;;  %134 = vperm.xlu0 %660, %v60_v0   ;;  %220 = vmatpush.bf16.msra.mxu0 %v640_v1 }
   0x3   :  { %v58_v4 = vld [vmem:[%s903_s2 + $0x60] sm:$0xff]  ;;  %661 = vset.pattern.permute.xlu1 %v689_v2  ;;  %114 = vperm.xlu2 %662, %v56_v5   ;;  %v638_v6 = vld [vmem:[%s902_s1 + $0x30] sm:$0xff] }
   0x4   :  { %124 = vperm.xlu1 %661, %v58_v4   ;;  %649 = vmatpush.bf16.msra.mxu2 %v640_v1 }
   0x5   :  { %592 = vmatmul.msk.bf16.vlgmr.msra.gmra.mxu0 %vm188_vm0, %v632_v3 }
   0x7   :  { %598 = vmatmul.msk.bf16.vlgmr.msra.gmra.mxu2 %vm188_vm0, %v638_v6 }
   0x8   :  { %12 = vsyncpa [#allocation3], 0  ;;  %v57_v8 = vld [vmem:[%s903_s2 + $0x58] sm:$0xff]  ;;  %v59_v9 = vld [vmem:[%s903_s2 + $0x68] sm:$0xff]  ;;  %s690_s24 = smov [#allocation2]  }
   0x9   :  { %v54_v10 = vld [vmem:[%s903_s2 + $0x40] sm:$0xff]  ;;  %v52_v11 = vld [vmem:[%s903_s2 + $0x30] sm:$0xff]  ;;  %v633_v12 = vld [vmem:[%s902_s1 + $0x8] sm:$0xff]  ;;  %s545_s25 = sshll.u32 %s690_s24, 4  ;;  %s546_s25 = int_to_ptr.vmem [resolvable:$true] %s545_s25 }
   0xa   :  { %139 = vperm.xlu0 %660, %v61_v7   ;;  %v55_v13 = vld [vmem:[%s903_s2 + $0x48] sm:$0xff]  ;;  %v639_v14 = vld [vmem:[%s902_s1 + $0x38] sm:$0xff]  ;;  %v50_v17 = vld [vmem:[%s903_s2 + $0x20] sm:$0xff] }
   0xb   :  { %119 = vperm.xlu2 %662, %v57_v8   ;;  %v53_v15 = vld [vmem:[%s903_s2 + $0x38] sm:$0xff]  ;;  %v51_v16 = vld [vmem:[%s903_s2 + $0x28] sm:$0xff]  ;;  %v48_v18 = vld [vmem:[%s903_s2 + $0x10] sm:$0xff] }
   0xc   :  { %129 = vperm.xlu1 %661, %v59_v9   ;;  %v46_v19 = vld [vmem:[%s903_s2] sm:$0xff]  ;;  %v634_v20 = vld [vmem:[%s902_s1 + $0x10] sm:$0xff]  ;;  %v49_v21 = vld [vmem:[%s903_s2 + $0x18] sm:$0xff] }
   0xd   :  { %v47_v22 = vld [vmem:[%s903_s2 + $0x8] sm:$0xff]  ;;  %v316_v23 = vld [vmem:[%s905_s4 + $0x70] sm:$0xff]  ;;  %v317_v24 = vld [vmem:[%s905_s4 + $0x78] sm:$0xff]  ;;  %s547_s2 = sshll.u32 %s908_s7, 4  ;;  %s548_s2 = int_to_ptr.hbm [resolvable:$true] %s547_s2 }
   0xe   :  { %v314_v25 = vld [vmem:[%s905_s4 + $0x60] sm:$0xff]  ;;  %v635_v26 = vld [vmem:[%s902_s1 + $0x18] sm:$0xff]  ;;  %v315_v27 = vld [vmem:[%s905_s4 + $0x68] sm:$0xff] }
   0xf   :  { %v312_v28 = vld [vmem:[%s905_s4 + $0x50] sm:$0xff]  ;;  %v313_v29 = vld [vmem:[%s905_s4 + $0x58] sm:$0xff]  ;;  %v311_v30 = vld [vmem:[%s905_s4 + $0x48] sm:$0xff] }
  0x10   :  { %v310_v31 = vld [vmem:[%s905_s4 + $0x40] sm:$0xff]  ;;  %v308_v32 = vld [vmem:[%s905_s4 + $0x30] sm:$0xff]  ;;  %v309_v35 = vld [vmem:[%s905_s4 + $0x38] sm:$0xff] }
  0x11   :  { %v306_v33 = vld [vmem:[%s905_s4 + $0x20] sm:$0xff]  ;;  %v307_v36 = vld [vmem:[%s905_s4 + $0x28] sm:$0xff]  ;;  %v305_v37 = vld [vmem:[%s905_s4 + $0x18] sm:$0xff] }
  0x12   :  { %104 = vperm.xlu0 %660, %v54_v10   ;;  %v636_v34 = vld [vmem:[%s902_s1 + $0x20] sm:$0xff]  ;;  %v304_v38 = vld [vmem:[%s905_s4 + $0x10] sm:$0xff]  ;;  %v637_v40 = vld [vmem:[%s902_s1 + $0x28] sm:$0xff] }
  0x13   :  { %94 = vperm.xlu2 %662, %v52_v11   ;;  %v302_v39 = vld [vmem:[%s905_s4] sm:$0xff]  ;;  %v303_v41 = vld [vmem:[%s905_s4 + $0x8] sm:$0xff] }
  0x14   :  { %109 = vperm.xlu1 %661, %v55_v13   ;;  %v520_v42 = vld [vmem:[%s907_s6] sm:$0xff] }
  0x15   :  { %593 = vmatmul.msk.bf16.gmra.mxu0 %vm188_vm0, %v633_v12 }
  0x17   :  { %599 = vmatmul.msk.bf16.gmra.mxu2 %vm188_vm0, %v639_v14 }
  0x1a   :  { %99 = vperm.xlu0 %660, %v53_v15  }
  0x1b   :  { %89 = vperm.xlu2 %662, %v51_v16  }
  0x1c   :  { %84 = vperm.xlu1 %661, %v50_v17  }
  0x22   :  { %74 = vperm.xlu0 %660, %v48_v18  }
  0x23   :  { %64 = vperm.xlu2 %662, %v46_v19  }
  0x24   :  { %79 = vperm.xlu1 %661, %v49_v21  }
  0x25   :  { %594 = vmatmul.msk.bf16.gmra.mxu0 %vm188_vm0, %v634_v20 }
  0x2a   :  { %69 = vperm.xlu0 %660, %v47_v22  }
  0x2b   :  { %395 = vperm.xlu2 %662, %v317_v24  }
  0x2c   :  { %390 = vperm.xlu1 %661, %v316_v23  }
  0x32   :  { %380 = vperm.xlu0 %660, %v314_v25  }
  0x33   :  { %370 = vperm.xlu2 %662, %v312_v28  }
  0x34   :  { %385 = vperm.xlu1 %661, %v315_v27  }
  0x35   :  { %595 = vmatmul.msk.bf16.gmra.mxu0 %vm188_vm0, %v635_v26 }
  0x3a   :  { %375 = vperm.xlu0 %660, %v313_v29  }
  0x3b   :  { %365 = vperm.xlu2 %662, %v311_v30  }
  0x3c   :  { %360 = vperm.xlu1 %661, %v310_v31  }
  0x42   :  { %350 = vperm.xlu0 %660, %v308_v32  }
  0x43   :  { %340 = vperm.xlu2 %662, %v306_v33  }
  0x44   :  { %355 = vperm.xlu1 %661, %v309_v35  }
  0x45   :  { %596 = vmatmul.msk.bf16.gmra.mxu0 %vm188_vm0, %v636_v34 }
  0x4a   :  { %345 = vperm.xlu0 %660, %v307_v36  }
  0x4b   :  { %335 = vperm.xlu2 %662, %v305_v37  }
  0x4c   :  { %330 = vperm.xlu1 %661, %v304_v38  }
  0x52   :  { %320 = vperm.xlu0 %660, %v302_v39  }
  0x53   :  { %523 = vperm.xlu2 %662, %v520_v42  }
  0x54   :  { %325 = vperm.xlu1 %661, %v303_v41  }
  0x55   :  { %597 = vmatmul.msk.bf16.gmra.mxu0 %vm188_vm0, %v637_v40 }
  0x5d   :  { %v115_v43 = vpop.permute.xlu2 %114 }
  0x65   :  { %v120_v46 = vpop.permute.xlu2 %119 }
  0x6d   :  { %v95_v50 = vpop.permute.xlu2 %94 }
  0x74   :  { %v135_v44 = vpop.permute.xlu0 %134 }
  0x75   :  { %v90_v56 = vpop.permute.xlu2 %89 }
  0x76   :  { %v125_v45 = vpop.permute.xlu1 %124 }
  0x7c   :  { %v140_v47 = vpop.permute.xlu0 %139 }
  0x7d   :  { %v65_v61 = vpop.permute.xlu2 %64 }
  0x7e   :  { %v130_v48 = vpop.permute.xlu1 %129 }
  0x82   :  { %v222_v49 = vpop.f32.mrf.mxu0 }
  0x83   :  { %v223_v2 = vadd.f32 %v222_v49, %v65_v61 }
  0x84   :  { %v105_v51 = vpop.permute.xlu0 %104 }
  0x85   :  { %v262_v8 = vmax.f32 %v223_v2, 0.0 }
  0x86   :  { %v110_v52 = vpop.permute.xlu1 %109 }
  0x8a   :  { %v224_v53 = vpop.f32.mrf.mxu0  ;;  %v252_v54 = vpop.f32.mrf.mxu2 }
  0x8b   :  { %v253_v12 = vadd.f32 %v252_v54, %v125_v45  ;;  %v646_v54 = vld [vmem:[%s904_s3 + $0x28] sm:$0xff] }
  0x8c   :  { %v100_v55 = vpop.permute.xlu0 %99 }
  0x8d   :  { %v274_v19 = vmax.f32 %v253_v12, 0.0 }
  0x8e   :  { %v85_v57 = vpop.permute.xlu1 %84 }
  0x92   :  { %v227_v58 = vpop.f32.mrf.mxu0  ;;  %v254_v59 = vpop.f32.mrf.mxu2 }
  0x93   :  { %v255_v13 = vadd.f32 %v254_v59, %v130_v48 }
  0x94   :  { %v75_v60 = vpop.permute.xlu0 %74 }
  0x95   :  { %v228_v63 = vadd.f32 %v227_v58, %v75_v60  ;;  %v275_v20 = vmax.f32 %v255_v13, 0.0  ;;  %v648_v58 = vld [vmem:[%s904_s3 + $0x38] sm:$0xff] }
  0x96   :  { %v80_v62 = vpop.permute.xlu1 %79 }
  0x97   :  { %v264_v5 = vmax.f32 %v228_v63, 0.0  ;;  %v300_v23 = vpack.c.bf16 %v275_v20, %v274_v19 }
  0x9a   :  { %v229_v0 = vpop.f32.mrf.mxu0  ;;  %v257_v1 = vpop.f32.mrf.mxu2 }
  0x9b   :  { %v230_v3 = vadd.f32 %v229_v0, %v80_v62  ;;  %v258_v10 = vadd.f32 %v257_v1, %v135_v44 }
  0x9c   :  { %v70_v4 = vpop.permute.xlu0 %69 }
  0x9d   :  { %v265_v6 = vmax.f32 %v230_v3, 0.0  ;;  %v225_v7 = vadd.f32 %v224_v53, %v70_v4  ;;  %v276_v17 = vmax.f32 %v258_v10, 0.0  ;;  %v642_v53 = vld [vmem:[%s904_s3 + $0x8] sm:$0xff] }
  0x9e   :  { %v391_v3 = vpop.permute.xlu1 %390 }
  0x9f   :  { %v263_v9 = vmax.f32 %v225_v7, 0.0  ;;  %v295_v11 = vpack.c.bf16 %v265_v6, %v264_v5  ;;  %v396_v5 = vpop.permute.xlu2 %395 }
  0xa1   :  { %v294_v14 = vpack.c.bf16 %v263_v9, %v262_v8 }
  0xa2   :  { %v232_v15 = vpop.f32.mrf.mxu0  ;;  %v259_v16 = vpop.f32.mrf.mxu2 }
  0xa3   :  { %v260_v18 = vadd.f32 %v259_v16, %v140_v47  ;;  %v233_v47 = vadd.f32 %v232_v15, %v85_v57  ;;  %v644_v57 = vld [vmem:[%s904_s3 + $0x18] sm:$0xff] }
  0xa4   :  { %v381_v9 = vpop.permute.xlu0 %380 }
  0xa5   :  { %v277_v21 = vmax.f32 %v260_v18, 0.0 }
  0xa6   :  { %v386_v7 = vpop.permute.xlu1 %385 }
  0xa7   :  { %v301_v22 = vpack.c.bf16 %v277_v21, %v276_v17  ;;  %v371_v10 = vpop.permute.xlu2 %370 }
  0xa9   :  { %446 = vmatpush.bf16.msra.mxu1 %v301_v22  ;;  %650 = vmatpush.bf16.msra.mxu3 %v301_v22 }
  0xaa   :  { %v234_v24 = vpop.f32.mrf.mxu0 }
  0xab   :  { %v235_v42 = vadd.f32 %v234_v24, %v90_v56  ;;  %v647_v56 = vld [vmem:[%s904_s3 + $0x30] sm:$0xff] }
  0xad   :  { %447 = vmatpush.bf16.msra.mxu1 %v300_v23  ;;  %651 = vmatpush.bf16.msra.mxu3 %v300_v23 }
  0xae   :  { %v361_v13 = vpop.permute.xlu1 %360 }
  0xaf   :  { %v366_v15 = vpop.permute.xlu2 %365 }
  0xb2   :  { %v237_v25 = vpop.f32.mrf.mxu0 }
  0xb3   :  { %v238_v40 = vadd.f32 %v237_v25, %v95_v50  ;;  %v641_v50 = vld [vmem:[%s904_s3] sm:$0xff] }
  0xb5   :  { %v268_v48 = vmax.f32 %v238_v40, 0.0 }
  0xb6   :  { %v356_v24 = vpop.permute.xlu1 %355 }
  0xba   :  { %v239_v26 = vpop.f32.mrf.mxu0 }
  0xbb   :  { %v240_v37 = vadd.f32 %v239_v26, %v100_v55  ;;  %v643_v55 = vld [vmem:[%s904_s3 + $0x10] sm:$0xff] }
  0xbd   :  { %v269_v44 = vmax.f32 %v240_v37, 0.0 }
  0xbf   :  { %v297_v49 = vpack.c.bf16 %v269_v44, %v268_v48 }
  0xc2   :  { %v242_v27 = vpop.f32.mrf.mxu0 }
  0xc3   :  { %v243_v34 = vadd.f32 %v242_v27, %v105_v51 }
  0xc5   :  { %v270_v41 = vmax.f32 %v243_v34, 0.0  ;;  %v341_v34 = vpop.permute.xlu2 %340 }
  0xca   :  { %v244_v28 = vpop.f32.mrf.mxu0 }
  0xcb   :  { %v245_v32 = vadd.f32 %v244_v28, %v110_v52  ;;  %v645_v52 = vld [vmem:[%s904_s3 + $0x20] sm:$0xff] }
  0xcd   :  { %v271_v38 = vmax.f32 %v245_v32, 0.0 }
  0xcf   :  { %v298_v45 = vpack.c.bf16 %v271_v38, %v270_v41  ;;  %v331_v41 = vpop.permute.xlu1 %330 }
  0xd2   :  { %v247_v29 = vpop.f32.mrf.mxu0 }
  0xd3   :  { %v248_v30 = vadd.f32 %v247_v29, %v115_v43  ;;  %v267_v43 = vmax.f32 %v235_v42, 0.0 }
  0xd5   :  { %v272_v35 = vmax.f32 %v248_v30, 0.0 }
  0xda   :  { %v249_v31 = vpop.f32.mrf.mxu0 }
  0xdb   :  { %v250_v33 = vadd.f32 %v249_v31, %v120_v46  ;;  %v266_v46 = vmax.f32 %v233_v47, 0.0 }
  0xdd   :  { %v273_v36 = vmax.f32 %v250_v33, 0.0  ;;  %v296_v51 = vpack.c.bf16 %v267_v43, %v266_v46 }
  0xdf   :  { %v299_v39 = vpack.c.bf16 %v273_v36, %v272_v35 }
  0xe1   :  { %448 = vmatpush.bf16.msra.mxu1 %v299_v39  ;;  %652 = vmatpush.bf16.msra.mxu3 %v299_v39 }
  0xe5   :  { %449 = vmatpush.bf16.msra.mxu1 %v298_v45  ;;  %653 = vmatpush.bf16.msra.mxu3 %v298_v45 }
  0xe9   :  { %450 = vmatpush.bf16.msra.mxu1 %v297_v49  ;;  %654 = vmatpush.bf16.msra.mxu3 %v297_v49 }
  0xed   :  { %451 = vmatpush.bf16.msra.mxu1 %v296_v51  ;;  %655 = vmatpush.bf16.msra.mxu3 %v296_v51  ;;  %v336_v51 = vpop.permute.xlu2 %335 }
  0xf1   :  { %452 = vmatpush.bf16.msra.mxu1 %v295_v11  ;;  %656 = vmatpush.bf16.msra.mxu3 %v295_v11 }
  0xf5   :  { %453 = vmatpush.bf16.msra.mxu1 %v294_v14  ;;  %657 = vmatpush.bf16.msra.mxu3 %v294_v14  ;;  %v376_v14 = vpop.permute.xlu0 %375 }
  0xf8   :  { %454 = vmatmul.bf16.vlgmr.msra.gmra.mxu1 %v641_v50  ;;  %474 = vmatmul.bf16.vlgmr.msra.gmra.mxu3 %v645_v52 }
  0xfd   :  { %v351_v28 = vpop.permute.xlu0 %350 }
 0x105   :  { %v346_v45 = vpop.permute.xlu0 %345 }
 0x108   :  { %459 = vmatmul.bf16.gmra.mxu1 %v642_v53  ;;  %479 = vmatmul.bf16.gmra.mxu3 %v646_v54 }
 0x118   :  { %464 = vmatmul.bf16.gmra.mxu1 %v643_v55  ;;  %484 = vmatmul.bf16.gmra.mxu3 %v647_v56  ;;  %v326_v56 = vpop.permute.xlu1 %325 }
 0x128   :  { %469 = vmatmul.bf16.gmra.mxu1 %v644_v57  ;;  %489 = vmatmul.bf16.gmra.mxu3 %v648_v58 }
 0x175   :  { %v889_v59 = vpop.f32.mrf.mxu1 }
 0x17b   :  { %v475_v60 = vpop.f32.mrf.mxu3 }
 0x17c   :  { %v476_v36 = vadd.f32 %v475_v60, %v361_v13 }
 0x17d   :  { %v891_v61 = vpop.f32.mrf.mxu1 }
 0x17e   :  { %v503_v42 = vmax.f32 %v476_v36, 0.0  ;;  %v458_v57 = vadd.f32 %v891_v61, %v326_v56 }
 0x183   :  { %v477_v62 = vpop.f32.mrf.mxu3 }
 0x184   :  { %v478_v31 = vadd.f32 %v477_v62, %v366_v15  ;;  %v321_v62 = vpop.permute.xlu0 %320 }
 0x185   :  { %v460_v63 = vpop.f32.mrf.mxu1 }
 0x186   :  { %v504_v38 = vmax.f32 %v478_v31, 0.0  ;;  %v461_v54 = vadd.f32 %v460_v63, %v331_v41  ;;  %v511_v63 = vld [vmem:[%s906_s5] sm:$0xf] }
 0x188   :  { %v516_v43 = vpack.c.bf16 %v504_v38, %v503_v42 }
 0x18b   :  { %v480_v0 = vpop.f32.mrf.mxu3 }
 0x18c   :  { %v481_v29 = vadd.f32 %v480_v0, %v371_v10  ;;  %v456_v0 = vadd.f32 %v889_v59, %v321_v62  ;;  %v524_v59 = vpop.permute.xlu2 %523 }
 0x18d   :  { %v462_v2 = vpop.f32.mrf.mxu1 }
 0x18e   :  { %v505_v37 = vmax.f32 %v481_v29, 0.0  ;;  %v463_v50 = vadd.f32 %v462_v2, %v336_v51 }
 0x190   :  { %v498_v58 = vmax.f32 %v463_v50, 0.0 }
 0x193   :  { %v482_v1 = vpop.f32.mrf.mxu3 }
 0x194   :  { %v483_v25 = vadd.f32 %v482_v1, %v376_v14  ;;  %v497_v1 = vmax.f32 %v461_v54, 0.0 }
 0x195   :  { %v465_v6 = vpop.f32.mrf.mxu1 }
 0x196   :  { %v506_v32 = vmax.f32 %v483_v25, 0.0  ;;  %v466_v49 = vadd.f32 %v465_v6, %v341_v34 }
 0x198   :  { %v517_v40 = vpack.c.bf16 %v506_v32, %v505_v37  ;;  %v499_v55 = vmax.f32 %v466_v49, 0.0 }
 0x19b   :  { %v485_v4 = vpop.f32.mrf.mxu3 }
 0x19c   :  { %v486_v21 = vadd.f32 %v485_v4, %v381_v9  ;;  %v513_v4 = vpack.c.bf16 %v498_v58, %v497_v1 }
 0x19d   :  { %v467_v11 = vpop.f32.mrf.mxu1 }
 0x19e   :  { %v507_v30 = vmax.f32 %v486_v21, 0.0  ;;  %v468_v47 = vadd.f32 %v467_v11, %v346_v45 }
 0x1a0   :  { %v500_v52 = vmax.f32 %v468_v47, 0.0 }
 0x1a2   :  { %v514_v60 = vpack.c.bf16 %v500_v52, %v499_v55 }
 0x1a3   :  { %v487_v8 = vpop.f32.mrf.mxu3 }
 0x1a4   :  { %v488_v19 = vadd.f32 %v487_v8, %v386_v7 }
 0x1a5   :  { %v470_v17 = vpop.f32.mrf.mxu1 }
 0x1a6   :  { %v508_v26 = vmax.f32 %v488_v19, 0.0  ;;  %v471_v44 = vadd.f32 %v470_v17, %v351_v28 }
 0x1a8   :  { %v518_v33 = vpack.c.bf16 %v508_v26, %v507_v30  ;;  %v501_v46 = vmax.f32 %v471_v44, 0.0 }
 0x1ab   :  { %v490_v12 = vpop.f32.mrf.mxu3 }
 0x1ac   :  { %v491_v16 = vadd.f32 %v490_v12, %v391_v3  ;;  %v496_v3 = vmax.f32 %v458_v57, 0.0 }
 0x1ad   :  { %v472_v35 = vpop.f32.mrf.mxu1 }
 0x1ae   :  { %v509_v22 = vmax.f32 %v491_v16, 0.0  ;;  %v473_v39 = vadd.f32 %v472_v35, %v356_v24 }
 0x1b0   :  { %v502_v48 = vmax.f32 %v473_v39, 0.0 }
 0x1b2   :  { %v515_v53 = vpack.c.bf16 %v502_v48, %v501_v46 }
 0x1b3   :  { %v492_v18 = vpop.f32.mrf.mxu3 }
 0x1b4   :  { %v493_v20 = vadd.f32 %v492_v18, %v396_v5  ;;  %v495_v5 = vmax.f32 %v456_v0, 0.0 }
 0x1b6   :  { %v510_v23 = vmax.f32 %v493_v20, 0.0  ;;  %v512_v2 = vpack.c.bf16 %v496_v3, %v495_v5 }
 0x1b8   :  { %v519_v27 = vpack.c.bf16 %v510_v23, %v509_v22 }
 0x1ba   :  { %526 = vmatpush.bf16.msrb.mxu2 %v519_v27 }
 0x1be   :  { %527 = vmatpush.bf16.msrb.mxu2 %v518_v33 }
 0x1c2   :  { %528 = vmatpush.bf16.msrb.mxu2 %v517_v40 }
 0x1c6   :  { %529 = vmatpush.bf16.msrb.mxu2 %v516_v43 }
 0x1ca   :  { %530 = vmatpush.bf16.msrb.mxu2 %v515_v53 }
 0x1ce   :  { %531 = vmatpush.bf16.msrb.mxu2 %v514_v60 }
 0x1d2   :  { %532 = vmatpush.bf16.msrb.mxu2 %v513_v4 }
 0x1d6   :  { %533 = vmatpush.bf16.msrb.mxu2 %v512_v2 }
 0x1d9   :  { %534 = vmatmul.bf16.vlgmr.msrb.gmra.mxu2 %v511_v63 }
 0x25c   :  { %v535_v61 = vpop.f32.mrf.mxu2 }
 0x25d   :  { %v536_v6 = vadd.f32 %v535_v61, %v524_v59 }
 0x25f   :  { %539 = vst [vmem:[#allocation2] sm:$0xff] %v536_v6 }
 0x260   :  { %550 = dma.vmem_to_hbm [thread:$0]  %s546_s25, 128, %s548_s2, [#allocation3]  }
 0x264   :  { %v537_v7 = vpop.f32.mrf.mxu2 }
 0x265   :  { %687 = dma.done.wait [#allocation3], 128  }
 0x266   :  { %688 = vsyncadd [#allocation3], 4294967168 }
 0x267   :  { %555 = vsyncpa [#allocation3], 1 }

</bundles_post_ra>
